<compile_context>
chip_gen: v7x
topology: tpu7x:2x2x1
jax: 0.10.0
libtpu: 0.0.40
codegen_flags: <defaults>
</compile_context>

<pallas_src>
import numpy as np
import jax
import jax.numpy as jnp
from jax.experimental import pallas as pl
from jax.experimental.pallas import tpu as pltpu

BN_EPS = 1e-5
NEG_SLOPE = 0.2
_HI = jax.lax.Precision.HIGHEST  # used only by the pure-JAX reference


# --------------------------------------------------------------------------------------
# Pallas kernel (built per static shape)
# --------------------------------------------------------------------------------------
def _make_kernel(n, h, w, c_in, c_out):
    rows = n * h
    cnt = float(n * h * w)
    lanes_out = w * c_out

    def kernel(x_ref, w1_ref, g1_ref, b1_ref, w2_ref, g2_ref, b2_ref, o_ref):
        # Per-image vertical boundary masks (hoisted: computed once per invocation).
        y_idx = jax.lax.broadcasted_iota(jnp.int32, (rows, 1), 0) % h
        not_top = y_idx != 0          # a "row above" exists within the same image
        not_bot = y_idx != (h - 1)    # a "row below" exists within the same image

        def shifted_inputs(x2d):
            # x_dn[r] = x2d[r-1], x_up[r] = x2d[r+1]; zero at each image's top / bottom row
            # (the H-direction conv zero padding).  Static slices + sublane concat + mask.
            zrow = jnp.zeros((1, x2d.shape[1]), x2d.dtype)
            x_dn = jnp.concatenate([zrow, x2d[:rows - 1, :]], axis=0)
            x_up = jnp.concatenate([x2d[1:, :], zrow], axis=0)
            x_dn = jnp.where(not_top, x_dn, jnp.zeros_like(x_dn))
            x_up = jnp.where(not_bot, x_up, jnp.zeros_like(x_up))
            return x_dn, x_up

        def conv3x3(x2d, wb_ref, cin):
            # x2d: (rows, W*cin) f32; wb_ref: (3*W*cin, W*Cout) bf16 band matrix with the
            # dx taps and the W-direction zero padding folded into each per-dy K block.
            k = w * cin
            x_dn, x_up = shifted_inputs(x2d)
            if (k % 128) == 0:
                # Lane-aligned: single fat matmul, K = 3*W*cin (fills the 256-deep MXU).
                x3 = jnp.concatenate(
                    [x_dn.astype(jnp.bfloat16), x2d.astype(jnp.bfloat16),
                     x_up.astype(jnp.bfloat16)], axis=1)
                return jnp.dot(x3, wb_ref[...], preferred_element_type=jnp.float32)
            # Not lane-aligned: 3 matmuls on the (smaller) shifted inputs, accumulated in
            # one expression (lets v7x use MRB in-place accumulation on the result path).
            wb = wb_ref[...]
            return (jnp.dot(x_dn.astype(jnp.bfloat16), wb[0 * k:1 * k, :],
                            preferred_element_type=jnp.float32)
                    + jnp.dot(x2d.astype(jnp.bfloat16), wb[1 * k:2 * k, :],
                              preferred_element_type=jnp.float32)
                    + jnp.dot(x_up.astype(jnp.bfloat16), wb[2 * k:3 * k, :],
                              preferred_element_type=jnp.float32))

        def lane_group_allreduce(v):
            # v: (r, W*Cout), lane = w*Cout + c.  Cyclic roll-and-add tree over the W lane
            # groups: after log2(W) steps every lane holds its channel's total over all W
            # groups (reduce + broadcast in one shot; XLU rolls + VPU adds, exact f32).
            shift = c_out
            while shift < lanes_out:
                v = v + pltpu.roll(v, shift=shift, axis=1)
                shift *= 2
            return v

        def bn_lrelu(acc, gamma_l, beta_l):
            # Single-pass train-mode BatchNorm2d over (N, H, W) per channel + LeakyReLU.
            # gamma_l / beta_l are pre-tiled to lane layout (1, W*Cout) on the host.
            s1 = jnp.sum(acc, axis=0, keepdims=True)         # (1, L) per-lane sum
            s2 = jnp.sum(acc * acc, axis=0, keepdims=True)   # (1, L) per-lane sum of squares
            stats = lane_group_allreduce(jnp.concatenate([s1, s2], axis=0))  # (2, L)
            mean = stats[0:1, :] * (1.0 / cnt)
            var = stats[1:2, :] * (1.0 / cnt) - mean * mean
            a = gamma_l * jax.lax.rsqrt(var + BN_EPS)        # (1, L)
            b = beta_l - a * mean                            # (1, L)
            y = acc * a + b                                  # sublane-broadcast FMA
            return jnp.maximum(y, NEG_SLOPE * y)             # LeakyReLU(0.2), single vmax

        y1 = bn_lrelu(conv3x3(x_ref[...], w1_ref, c_in), g1_ref[...], b1_ref[...])
        y2 = bn_lrelu(conv3x3(y1, w2_ref, c_out), g2_ref[...], b2_ref[...])
        o_ref[...] = y2                                      # lane-dense, unmasked store

    return kernel


# --------------------------------------------------------------------------------------
# Wrapper (NHWC in / out; reshapes to/from (N*H, W*C) are contiguous and free)
# --------------------------------------------------------------------------------------
def _vmem_budget_bytes(rows, w, c_in, c_out):
    lanes = w * c_out
    est = (rows * w * c_in * 4                    # x2d
           + 4 * rows * lanes * 4                 # acc / y1 / y2 / temps (f32)
           + 3 * rows * w * c_in * 4              # stage-1 shifted inputs
           + 3 * rows * lanes * 2                 # stage-2 bf16 K-concat input
           + (3 * w * c_in * lanes + 3 * lanes * lanes) * 2   # band matrices (bf16)
           + rows * lanes * 4)                    # output
    return int(min(48 * 1024 * 1024, max(16 * 1024 * 1024, 2 * est)))


def encoder_block(x_nhwc, kp):
    n, h, w, c_in = x_nhwc.shape
    c_out = kp["c_out"]
    rows, lanes = n * h, w * c_out
    x2d = x_nhwc.reshape(rows, w * c_in)          # free contiguous reshape, no transpose
    out2d = pl.pallas_call(
        _make_kernel(n, h, w, c_in, c_out),
        out_shape=jax.ShapeDtypeStruct((rows, lanes), jnp.float32),
        compiler_params=pltpu.CompilerParams(
            vmem_limit_bytes=_vmem_budget_bytes(rows, w, c_in, c_out)),
    )(x2d, kp["w1_bands"], kp["g1"], kp["beta1"],
      kp["w2_bands"], kp["g2"], kp["beta2"])
    return out2d.reshape(n, h, w, c_out)


# --------------------------------------------------------------------------------------
# Parameter preparation (host-side, once)
# --------------------------------------------------------------------------------------
def _conv_bands(w_hwio, width):
    """(3,3,Cin,Cout) conv weights -> (3*W*Cin, W*Cout) band matrix (dx taps and the
    W-direction zero padding folded in, per-dy K blocks), bf16 for the native MXU path."""
    w_np = np.asarray(w_hwio, np.float32)
    _, _, cin, cout = w_np.shape
    bands = np.zeros((3, width * cin, width * cout), np.float32)
    for dy in range(3):
        for dx in range(3):
            for wo in range(width):
                wi = wo + dx - 1  # input column feeding output column wo through tap dx
                if 0 <= wi < width:
                    bands[dy, wi * cin:(wi + 1) * cin, wo * cout:(wo + 1) * cout] = w_np[dy, dx]
    return jnp.asarray(bands.reshape(3 * width * cin, width * cout), jnp.bfloat16)


def prepare_kernel_params(params, n, h, w):
    c_out = params["w1"].shape[-1]
    assert (w & (w - 1)) == 0, "W must be a power of two for the lane roll-reduce tree"
    assert (w * c_out) % 128 == 0, "W*Cout must be a multiple of 128 for unmasked stores"
    # TODO(synk): pad W / Cout instead of asserting when shapes are not lane-aligned.

    def tile_lanes(v):  # (1, Cout) -> (1, W*Cout); lane l = w*Cout + c receives v[c]
        return jnp.tile(jnp.asarray(v, jnp.float32).reshape(1, c_out), (1, w))

    return {
        "c_out": c_out,
        # Conv biases b1/b2 intentionally omitted: train-mode BN cancels them exactly.
        "w1_bands": _conv_bands(params["w1"], w),
        "w2_bands": _conv_bands(params["w2"], w),
        "g1": tile_lanes(params["g1"]), "beta1": tile_lanes(params["beta1"]),
        "g2": tile_lanes(params["g2"]), "beta2": tile_lanes(params["beta2"]),
    }


def init_params(key, in_channels, out_channels):
    ks = jax.random.split(key, 4)
    return {
        "w1": 0.1 * jax.random.normal(ks[0], (3, 3, in_channels, out_channels), jnp.float32),
        "b1": 0.1 * jax.random.normal(ks[1], (1, out_channels), jnp.float32),
        "g1": jnp.full((1, out_channels), 1.5, jnp.float32),
        "beta1": jnp.full((1, out_channels), -0.3, jnp.float32),
        "w2": 0.1 * jax.random.normal(ks[2], (3, 3, out_channels, out_channels), jnp.float32),
        "b2": 0.1 * jax.random.normal(ks[3], (1, out_channels), jnp.float32),
        "g2": jnp.full((1, out_channels), 0.8, jnp.float32),
        "beta2": jnp.full((1, out_channels), 0.2, jnp.float32),
    }


# --------------------------------------------------------------------------------------
# Pure-JAX NHWC reference matching the PyTorch EncoderBlock (train-mode BN, with conv bias)
# --------------------------------------------------------------------------------------
def reference_forward(x_nhwc, params):
    def stage(x, wt, b, g, beta):
        y = jax.lax.conv_general_dilated(
            x, wt, window_strides=(1, 1), padding=((1, 1), (1, 1)),
            dimension_numbers=("NHWC", "HWIO", "NHWC"), precision=_HI)
        y = y + b.reshape(1, 1, 1, -1)
        mean = jnp.mean(y, axis=(0, 1, 2), keepdims=True)
        var = jnp.mean(jnp.square(y - mean), axis=(0, 1, 2), keepdims=True)
        y = (y - mean) / jnp.sqrt(var + BN_EPS)
        y = y * g.reshape(1, 1, 1, -1) + beta.reshape(1, 1, 1, -1)
        return jnp.where(y >= 0.0, y, NEG_SLOPE * y)

    y = stage(x_nhwc, params["w1"], params["b1"], params["g1"], params["beta1"])
    y = stage(y, params["w2"], params["b2"], params["g2"], params["beta2"])
    return y


if __name__ == "__main__":
    key = jax.random.PRNGKey(0)
    k_x, k_p = jax.random.split(key)
    N, C_IN, C_OUT, H, W = 2, 4, 8, 16, 16

    x = jax.random.normal(k_x, (N, H, W, C_IN), jnp.float32)   # NHWC end-to-end
    params = init_params(k_p, C_IN, C_OUT)
    kparams = prepare_kernel_params(params, N, H, W)

    out = jax.block_until_ready(encoder_block(x, kparams))
    ref = jax.block_until_ready(reference_forward(x, params))

    assert out.shape == (N, H, W, C_OUT), out.shape
    max_err = float(jnp.max(jnp.abs(out - ref)))
    assert jnp.allclose(out, ref, rtol=2e-2, atol=2e-2), max_err
    print("KERNEL_OK")
</pallas_src>

<mosaic_0001>
module attributes {stable_mosaic.version = 11 : i64} {
  func.func @kernel(%arg0: memref<32x64xf32, #tpu.memory_space<vmem>>, %arg1: memref<192x128xbf16, #tpu.memory_space<vmem>>, %arg2: memref<1x128xf32, #tpu.memory_space<vmem>>, %arg3: memref<1x128xf32, #tpu.memory_space<vmem>>, %arg4: memref<384x128xbf16, #tpu.memory_space<vmem>>, %arg5: memref<1x128xf32, #tpu.memory_space<vmem>>, %arg6: memref<1x128xf32, #tpu.memory_space<vmem>>, %arg7: memref<32x128xf32, #tpu.memory_space<vmem>>) attributes {dimension_semantics = [], scalar_prefetch = 0 : i64, scratch_operands = 0 : i64, tpu.core_type = #tpu.core_type<tc>} {
    %0 = tpu.iota {dimensions = array<i32: 0>} : vector<32x1xi32>
    %c16_i32 = arith.constant 16 : i32
    %c0_i32 = arith.constant 0 : i32
    %1 = arith.cmpi eq, %c16_i32, %c0_i32 : i32
    %c1_i32 = arith.constant 1 : i32
    %2 = arith.select %1, %c1_i32, %c16_i32 : i32
    %3 = vector.broadcast %2 : i32 to vector<32x1xi32>
    %4 = arith.remsi %0, %3 : vector<32x1xi32>
    %c0_i32_0 = arith.constant 0 : i32
    %5 = vector.broadcast %c0_i32_0 : i32 to vector<32x1xi32>
    %6 = arith.cmpi ne, %4, %5 : vector<32x1xi32>
    %c0_i32_1 = arith.constant 0 : i32
    %7 = vector.broadcast %c0_i32_1 : i32 to vector<32x1xi32>
    %8 = arith.cmpi slt, %4, %7 : vector<32x1xi32>
    %c0_i32_2 = arith.constant 0 : i32
    %9 = arith.cmpi slt, %2, %c0_i32_2 : i32
    %10 = vector.broadcast %9 : i1 to vector<32x1xi1>
    %11 = vector.broadcast %10 : vector<32x1xi1> to vector<32x1xi1>
    %12 = arith.xori %8, %11 : vector<32x1xi1>
    %13 = arith.andi %12, %6 : vector<32x1xi1>
    %14 = vector.broadcast %2 : i32 to vector<32x1xi32>
    %15 = arith.addi %4, %14 : vector<32x1xi32>
    %16 = arith.select %13, %15, %4 : vector<32x1xi1>, vector<32x1xi32>
    %c0_i32_3 = arith.constant 0 : i32
    %17 = vector.broadcast %c0_i32_3 : i32 to vector<32x1xi32>
    %18 = arith.cmpi ne, %16, %17 : vector<32x1xi32>
    %c15_i32 = arith.constant 15 : i32
    %19 = vector.broadcast %c15_i32 : i32 to vector<32x1xi32>
    %20 = arith.cmpi ne, %16, %19 : vector<32x1xi32>
    %c0 = arith.constant 0 : index
    %c0_4 = arith.constant 0 : index
    %21 = vector.load %arg0[%c0, %c0_4] : memref<32x64xf32, #tpu.memory_space<vmem>>, vector<32x64xf32>
    %cst = arith.constant 0.000000e+00 : f32
    %22 = vector.broadcast %cst : f32 to vector<1x64xf32>
    %23 = vector.extract_strided_slice %21 {offsets = [0, 0], sizes = [31, 64], strides = [1, 1]} : vector<32x64xf32> to vector<31x64xf32>
    %24 = tpu.concatenate %22, %23 in 0 : vector<1x64xf32>, vector<31x64xf32> -> vector<32x64xf32>
    %25 = vector.extract_strided_slice %21 {offsets = [1, 0], sizes = [31, 64], strides = [1, 1]} : vector<32x64xf32> to vector<31x64xf32>
    %26 = tpu.concatenate %25, %22 in 0 : vector<31x64xf32>, vector<1x64xf32> -> vector<32x64xf32>
    %cst_5 = arith.constant 0.000000e+00 : f32
    %27 = vector.broadcast %cst_5 : f32 to vector<32x64xf32>
    %28 = vector.shape_cast %18 : vector<32x1xi1> to vector<32x1xi1>
    %29 = vector.broadcast %28 : vector<32x1xi1> to vector<32x64xi1>
    %30 = arith.select %29, %24, %27 : vector<32x64xi1>, vector<32x64xf32>
    %cst_6 = arith.constant 0.000000e+00 : f32
    %31 = vector.broadcast %cst_6 : f32 to vector<32x64xf32>
    %32 = vector.shape_cast %20 : vector<32x1xi1> to vector<32x1xi1>
    %33 = vector.broadcast %32 : vector<32x1xi1> to vector<32x64xi1>
    %34 = arith.select %33, %26, %31 : vector<32x64xi1>, vector<32x64xf32>
    %c0_7 = arith.constant 0 : index
    %c0_8 = arith.constant 0 : index
    %35 = vector.load %arg1[%c0_7, %c0_8] : memref<192x128xbf16, #tpu.memory_space<vmem>>, vector<192x128xbf16>
    %36 = arith.truncf %30 : vector<32x64xf32> to vector<32x64xbf16>
    %37 = vector.extract_strided_slice %35 {offsets = [0, 0], sizes = [64, 128], strides = [1, 1]} : vector<192x128xbf16> to vector<64x128xbf16>
    %cst_9 = arith.constant dense<0.000000e+00> : vector<32x128xf32>
    %38 = tpu.matmul %36, %37, %cst_9 {dimension_numbers = #tpu.dot_dimension_numbers<[1], [0], [0], [1], [0, 0, 1, 1], [], []>} : vector<32x64xbf16>, vector<64x128xbf16>, vector<32x128xf32> -> vector<32x128xf32>
    %39 = arith.truncf %21 : vector<32x64xf32> to vector<32x64xbf16>
    %40 = vector.extract_strided_slice %35 {offsets = [64, 0], sizes = [64, 128], strides = [1, 1]} : vector<192x128xbf16> to vector<64x128xbf16>
    %cst_10 = arith.constant dense<0.000000e+00> : vector<32x128xf32>
    %41 = tpu.matmul %39, %40, %cst_10 {dimension_numbers = #tpu.dot_dimension_numbers<[1], [0], [0], [1], [0, 0, 1, 1], [], []>} : vector<32x64xbf16>, vector<64x128xbf16>, vector<32x128xf32> -> vector<32x128xf32>
    %42 = arith.addf %38, %41 : vector<32x128xf32>
    %43 = arith.truncf %34 : vector<32x64xf32> to vector<32x64xbf16>
    %44 = vector.extract_strided_slice %35 {offsets = [128, 0], sizes = [64, 128], strides = [1, 1]} : vector<192x128xbf16> to vector<64x128xbf16>
    %cst_11 = arith.constant dense<0.000000e+00> : vector<32x128xf32>
    %45 = tpu.matmul %43, %44, %cst_11 {dimension_numbers = #tpu.dot_dimension_numbers<[1], [0], [0], [1], [0, 0, 1, 1], [], []>} : vector<32x64xbf16>, vector<64x128xbf16>, vector<32x128xf32> -> vector<32x128xf32>
    %46 = arith.addf %42, %45 : vector<32x128xf32>
    %c0_12 = arith.constant 0 : index
    %c0_13 = arith.constant 0 : index
    %47 = vector.load %arg2[%c0_12, %c0_13] : memref<1x128xf32, #tpu.memory_space<vmem>>, vector<1x128xf32>
    %c0_14 = arith.constant 0 : index
    %c0_15 = arith.constant 0 : index
    %48 = vector.load %arg3[%c0_14, %c0_15] : memref<1x128xf32, #tpu.memory_space<vmem>>, vector<1x128xf32>
    %cst_16 = arith.constant dense<0.000000e+00> : vector<128xf32>
    %49 = vector.multi_reduction <add>, %46, %cst_16 [0] : vector<32x128xf32> to vector<128xf32>
    %50 = vector.shape_cast %49 : vector<128xf32> to vector<1x128xf32>
    %51 = arith.mulf %46, %46 : vector<32x128xf32>
    %cst_17 = arith.constant dense<0.000000e+00> : vector<128xf32>
    %52 = vector.multi_reduction <add>, %51, %cst_17 [0] : vector<32x128xf32> to vector<128xf32>
    %53 = vector.shape_cast %52 : vector<128xf32> to vector<1x128xf32>
    %54 = tpu.concatenate %50, %53 in 0 : vector<1x128xf32>, vector<1x128xf32> -> vector<2x128xf32>
    %c8_i32 = arith.constant 8 : i32
    %55 = tpu.dynamic_rotate %54 by %c8_i32 dim 1 : vector<2x128xf32>, i32 -> vector<2x128xf32>
    %56 = arith.addf %54, %55 : vector<2x128xf32>
    %c16_i32_18 = arith.constant 16 : i32
    %57 = tpu.dynamic_rotate %56 by %c16_i32_18 dim 1 : vector<2x128xf32>, i32 -> vector<2x128xf32>
    %58 = arith.addf %56, %57 : vector<2x128xf32>
    %c32_i32 = arith.constant 32 : i32
    %59 = tpu.dynamic_rotate %58 by %c32_i32 dim 1 : vector<2x128xf32>, i32 -> vector<2x128xf32>
    %60 = arith.addf %58, %59 : vector<2x128xf32>
    %c64_i32 = arith.constant 64 : i32
    %61 = tpu.dynamic_rotate %60 by %c64_i32 dim 1 : vector<2x128xf32>, i32 -> vector<2x128xf32>
    %62 = arith.addf %60, %61 : vector<2x128xf32>
    %63 = vector.extract_strided_slice %62 {offsets = [0, 0], sizes = [1, 128], strides = [1, 1]} : vector<2x128xf32> to vector<1x128xf32>
    %cst_19 = arith.constant 0.001953125 : f32
    %64 = vector.broadcast %cst_19 : f32 to vector<1x128xf32>
    %65 = arith.mulf %63, %64 : vector<1x128xf32>
    %66 = vector.extract_strided_slice %62 {offsets = [1, 0], sizes = [1, 128], strides = [1, 1]} : vector<2x128xf32> to vector<1x128xf32>
    %cst_20 = arith.constant 0.001953125 : f32
    %67 = vector.broadcast %cst_20 : f32 to vector<1x128xf32>
    %68 = arith.mulf %66, %67 : vector<1x128xf32>
    %69 = arith.mulf %65, %65 : vector<1x128xf32>
    %70 = arith.subf %68, %69 : vector<1x128xf32>
    %cst_21 = arith.constant 9.99999974E-6 : f32
    %71 = vector.broadcast %cst_21 : f32 to vector<1x128xf32>
    %72 = arith.addf %70, %71 : vector<1x128xf32>
    %73 = math.rsqrt %72 : vector<1x128xf32>
    %74 = arith.mulf %47, %73 : vector<1x128xf32>
    %75 = arith.mulf %74, %65 : vector<1x128xf32>
    %76 = arith.subf %48, %75 : vector<1x128xf32>
    %77 = vector.broadcast %74 : vector<1x128xf32> to vector<32x128xf32>
    %78 = arith.mulf %46, %77 : vector<32x128xf32>
    %79 = vector.broadcast %76 : vector<1x128xf32> to vector<32x128xf32>
    %80 = arith.addf %78, %79 : vector<32x128xf32>
    %cst_22 = arith.constant 2.000000e-01 : f32
    %81 = vector.broadcast %cst_22 : f32 to vector<32x128xf32>
    %82 = arith.mulf %81, %80 : vector<32x128xf32>
    %83 = arith.maximumf %80, %82 : vector<32x128xf32>
    %cst_23 = arith.constant 0.000000e+00 : f32
    %84 = vector.broadcast %cst_23 : f32 to vector<1x128xf32>
    %85 = vector.extract_strided_slice %83 {offsets = [0, 0], sizes = [31, 128], strides = [1, 1]} : vector<32x128xf32> to vector<31x128xf32>
    %86 = tpu.concatenate %84, %85 in 0 : vector<1x128xf32>, vector<31x128xf32> -> vector<32x128xf32>
    %87 = vector.extract_strided_slice %83 {offsets = [1, 0], sizes = [31, 128], strides = [1, 1]} : vector<32x128xf32> to vector<31x128xf32>
    %88 = tpu.concatenate %87, %84 in 0 : vector<31x128xf32>, vector<1x128xf32> -> vector<32x128xf32>
    %cst_24 = arith.constant 0.000000e+00 : f32
    %89 = vector.broadcast %cst_24 : f32 to vector<32x128xf32>
    %90 = vector.shape_cast %18 : vector<32x1xi1> to vector<32x1xi1>
    %91 = vector.broadcast %90 : vector<32x1xi1> to vector<32x128xi1>
    %92 = arith.select %91, %86, %89 : vector<32x128xi1>, vector<32x128xf32>
    %cst_25 = arith.constant 0.000000e+00 : f32
    %93 = vector.broadcast %cst_25 : f32 to vector<32x128xf32>
    %94 = vector.shape_cast %20 : vector<32x1xi1> to vector<32x1xi1>
    %95 = vector.broadcast %94 : vector<32x1xi1> to vector<32x128xi1>
    %96 = arith.select %95, %88, %93 : vector<32x128xi1>, vector<32x128xf32>
    %97 = arith.truncf %92 : vector<32x128xf32> to vector<32x128xbf16>
    %98 = arith.truncf %83 : vector<32x128xf32> to vector<32x128xbf16>
    %99 = arith.truncf %96 : vector<32x128xf32> to vector<32x128xbf16>
    %100 = tpu.concatenate %97, %98, %99 in 1 : vector<32x128xbf16>, vector<32x128xbf16>, vector<32x128xbf16> -> vector<32x384xbf16>
    %c0_26 = arith.constant 0 : index
    %c0_27 = arith.constant 0 : index
    %101 = vector.load %arg4[%c0_26, %c0_27] : memref<384x128xbf16, #tpu.memory_space<vmem>>, vector<384x128xbf16>
    %cst_28 = arith.constant dense<0.000000e+00> : vector<32x128xf32>
    %102 = tpu.matmul %100, %101, %cst_28 {dimension_numbers = #tpu.dot_dimension_numbers<[1], [0], [0], [1], [0, 0, 1, 1], [], []>} : vector<32x384xbf16>, vector<384x128xbf16>, vector<32x128xf32> -> vector<32x128xf32>
    %c0_29 = arith.constant 0 : index
    %c0_30 = arith.constant 0 : index
    %103 = vector.load %arg5[%c0_29, %c0_30] : memref<1x128xf32, #tpu.memory_space<vmem>>, vector<1x128xf32>
    %c0_31 = arith.constant 0 : index
    %c0_32 = arith.constant 0 : index
    %104 = vector.load %arg6[%c0_31, %c0_32] : memref<1x128xf32, #tpu.memory_space<vmem>>, vector<1x128xf32>
    %cst_33 = arith.constant dense<0.000000e+00> : vector<128xf32>
    %105 = vector.multi_reduction <add>, %102, %cst_33 [0] : vector<32x128xf32> to vector<128xf32>
    %106 = vector.shape_cast %105 : vector<128xf32> to vector<1x128xf32>
    %107 = arith.mulf %102, %102 : vector<32x128xf32>
    %cst_34 = arith.constant dense<0.000000e+00> : vector<128xf32>
    %108 = vector.multi_reduction <add>, %107, %cst_34 [0] : vector<32x128xf32> to vector<128xf32>
    %109 = vector.shape_cast %108 : vector<128xf32> to vector<1x128xf32>
    %110 = tpu.concatenate %106, %109 in 0 : vector<1x128xf32>, vector<1x128xf32> -> vector<2x128xf32>
    %c8_i32_35 = arith.constant 8 : i32
    %111 = tpu.dynamic_rotate %110 by %c8_i32_35 dim 1 : vector<2x128xf32>, i32 -> vector<2x128xf32>
    %112 = arith.addf %110, %111 : vector<2x128xf32>
    %c16_i32_36 = arith.constant 16 : i32
    %113 = tpu.dynamic_rotate %112 by %c16_i32_36 dim 1 : vector<2x128xf32>, i32 -> vector<2x128xf32>
    %114 = arith.addf %112, %113 : vector<2x128xf32>
    %c32_i32_37 = arith.constant 32 : i32
    %115 = tpu.dynamic_rotate %114 by %c32_i32_37 dim 1 : vector<2x128xf32>, i32 -> vector<2x128xf32>
    %116 = arith.addf %114, %115 : vector<2x128xf32>
    %c64_i32_38 = arith.constant 64 : i32
    %117 = tpu.dynamic_rotate %116 by %c64_i32_38 dim 1 : vector<2x128xf32>, i32 -> vector<2x128xf32>
    %118 = arith.addf %116, %117 : vector<2x128xf32>
    %119 = vector.extract_strided_slice %118 {offsets = [0, 0], sizes = [1, 128], strides = [1, 1]} : vector<2x128xf32> to vector<1x128xf32>
    %cst_39 = arith.constant 0.001953125 : f32
    %120 = vector.broadcast %cst_39 : f32 to vector<1x128xf32>
    %121 = arith.mulf %119, %120 : vector<1x128xf32>
    %122 = vector.extract_strided_slice %118 {offsets = [1, 0], sizes = [1, 128], strides = [1, 1]} : vector<2x128xf32> to vector<1x128xf32>
    %cst_40 = arith.constant 0.001953125 : f32
    %123 = vector.broadcast %cst_40 : f32 to vector<1x128xf32>
    %124 = arith.mulf %122, %123 : vector<1x128xf32>
    %125 = arith.mulf %121, %121 : vector<1x128xf32>
    %126 = arith.subf %124, %125 : vector<1x128xf32>
    %cst_41 = arith.constant 9.99999974E-6 : f32
    %127 = vector.broadcast %cst_41 : f32 to vector<1x128xf32>
    %128 = arith.addf %126, %127 : vector<1x128xf32>
    %129 = math.rsqrt %128 : vector<1x128xf32>
    %130 = arith.mulf %103, %129 : vector<1x128xf32>
    %131 = arith.mulf %130, %121 : vector<1x128xf32>
    %132 = arith.subf %104, %131 : vector<1x128xf32>
    %133 = vector.broadcast %130 : vector<1x128xf32> to vector<32x128xf32>
    %134 = arith.mulf %102, %133 : vector<32x128xf32>
    %135 = vector.broadcast %132 : vector<1x128xf32> to vector<32x128xf32>
    %136 = arith.addf %134, %135 : vector<32x128xf32>
    %cst_42 = arith.constant 2.000000e-01 : f32
    %137 = vector.broadcast %cst_42 : f32 to vector<32x128xf32>
    %138 = arith.mulf %137, %136 : vector<32x128xf32>
    %139 = arith.maximumf %136, %138 : vector<32x128xf32>
    %c0_43 = arith.constant 0 : index
    %c0_44 = arith.constant 0 : index
    %140 = vector.load %arg7[%c0_43, %c0_44] : memref<32x128xf32, #tpu.memory_space<vmem>>, vector<32x128xf32>
    tpu.vector_store %arg7[%c0_43, %c0_44], %139 {strides = array<i32>} : memref<32x128xf32, #tpu.memory_space<vmem>>, vector<32x128xf32>,
    return
  }
}

</mosaic_0001>

<bundles_post_ra>
// kernel: tpu_custom_call.1
= control target key start
LH: loop header
LB: loop body
LE: loop exit
PB: predicated region body
PF: predicated region fallthrough
CT: control target
= control target key end

     0   :  { %12 = vsyncpa [#allocation3], 0  ;;  %s1565_s0 = inlined_call_operand.hbm [shape: f32[32,64], index: 0, kind: input, shape index: {}]   ;;  %s1566_s1 = inlined_call_operand.hbm [shape: bf16[192,128], index: 1, kind: input, shape index: {}]   ;;  %s1567_s2 = inlined_call_operand.vmem [shape: f32[1,128], index: 2, kind: input, shape index: {}]   ;;  %s1568_s3 = inlined_call_operand.vmem [shape: f32[1,128], index: 3, kind: input, shape index: {}]   ;;  %s1569_s4 = inlined_call_operand.hbm [shape: bf16[384,128], index: 4, kind: input, shape index: {}]   ;;  %s1570_s5 = inlined_call_operand.vmem [shape: f32[1,128], index: 5, kind: input, shape index: {}]   ;;  %s1571_s6 = inlined_call_operand.vmem [shape: f32[1,128], index: 6, kind: input, shape index: {}]   ;;  %s1572_s7 = inlined_call_operand.hbm [shape: f32[32,128], index: 7, kind: output, shape index: {}]  }
   0x1   :  { %13 = vsyncpa [#allocation6], 0 }
   0x2   :  { %14 = vsyncpa [#allocation4], 0  ;;  %s1320_s24 = smov [#allocation5]   ;;  %s1226_s28 = scalar_lea.hbm %s1566_s1, 1536 }
   0x3   :  { %s32_s25 = sshll.u32 %s1320_s24, 4  ;;  %p1227_p0 = scmp.ne.s32.totalorder %s1566_s1, %s1226_s28  ;;  %s33_s25 = int_to_ptr.vmem [resolvable:$true] %s32_s25 }
   0x4   :  { %p1230_p1 = scmp.lt.u32.totalorder %s1226_s28, %s1566_s1 }
   0x6   :  { %p1232_p2 = pnand %p1230_p1, %p1227_p0 }
   0x8   :  { %1235 = shalt.err (!%p1232_p2)
}
   0x9   :  { %s1236_s10 = scalar_lea.vmem %s33_s25, 1536  ;;  %p1241_p4 = scmp.lt.s32.totalorder %s33_s25, %s33_s25 }
   0xa   :  { %p1237_p3 = scmp.ne.s32.totalorder %s33_s25, %s1236_s10  ;;  %p1242_p5 = scmp.lt.s32.totalorder %s1236_s10, %s1236_s10 }
   0xc   :  { %p1243_p6 = por %p1242_p5, %p1241_p4 }
   0xe   :  { %p1244_p7 = pnand %p1243_p6, %p1237_p3 }
  0x10   :  { %1247 = shalt.err (!%p1244_p7)
}
  0x11   :  { %s1321_s11 = smov 64   ;;  %s1322_s12 = smov 4  }
  0x12   :  { %38 = dma.hbm_to_vmem [thread:$0]  %s1566_s1, 1536, %s33_s25, [#allocation6], %s1321_s11, %s1321_s11, %s1322_s12  }
  0x13   :  { %s1323_s15 = smov [#allocation2]   ;;  %s1248_s19 = scalar_lea.hbm %s1565_s0, 512 }
  0x14   :  { %s20_s16 = sshll.u32 %s1323_s15, 4  ;;  %p1249_p8 = scmp.ne.s32.totalorder %s1565_s0, %s1248_s19  ;;  %s21_s16 = int_to_ptr.vmem [resolvable:$true] %s20_s16 }
  0x15   :  { %p1252_p9 = scmp.lt.u32.totalorder %s1248_s19, %s1565_s0 }
  0x17   :  { %p1254_p10 = pnand %p1252_p9, %p1249_p8 }
  0x19   :  { %1257 = shalt.err (!%p1254_p10)
}
  0x1a   :  { %s1258_s24 = scalar_lea.vmem %s21_s16, 512  ;;  %p1263_p12 = scmp.lt.s32.totalorder %s21_s16, %s21_s16 }
  0x1b   :  { %p1259_p11 = scmp.ne.s32.totalorder %s21_s16, %s1258_s24  ;;  %p1264_p13 = scmp.lt.s32.totalorder %s1258_s24, %s1258_s24 }
  0x1d   :  { %p1265_p0 = por %p1264_p13, %p1263_p12 }
  0x1f   :  { %p1266_p1 = pnand %p1265_p0, %p1259_p11 }
  0x21   :  { %1269 = shalt.err (!%p1266_p1)
}
  0x22   :  { %s1324_s1 = smov 128   ;;  %s1325_s25 = smov 8  }
  0x23   :  { %26 = dma.hbm_to_vmem [thread:$0]  %s1565_s0, 512, %s21_s16, [#allocation3], %s1324_s1, %s1324_s1, %s1325_s25  }
  0x24   :  { %s1326_s28 = smov [#allocation7]   ;;  %s1270_s9 = scalar_lea.hbm %s1569_s4, 3072 }
  0x25   :  { %s48_s29 = sshll.u32 %s1326_s28, 4  ;;  %p1271_p2 = scmp.ne.s32.totalorder %s1569_s4, %s1270_s9  ;;  %s49_s29 = int_to_ptr.vmem [resolvable:$true] %s48_s29 }
  0x26   :  { %p1274_p3 = scmp.lt.u32.totalorder %s1270_s9, %s1569_s4 }
  0x28   :  { %p1276_p4 = pnand %p1274_p3, %p1271_p2 }
  0x2a   :  { %1279 = shalt.err (!%p1276_p4)
}
  0x2b   :  { %s1280_s17 = scalar_lea.vmem %s49_s29, 3072  ;;  %p1285_p6 = scmp.lt.s32.totalorder %s49_s29, %s49_s29 }
  0x2c   :  { %p1281_p5 = scmp.ne.s32.totalorder %s49_s29, %s1280_s17  ;;  %p1286_p7 = scmp.lt.s32.totalorder %s1280_s17, %s1280_s17 }
  0x2e   :  { %p1287_p8 = por %p1286_p7, %p1285_p6 }
  0x30   :  { %p1288_p9 = pnand %p1287_p8, %p1281_p5 }
  0x32   :  { %1291 = shalt.err (!%p1288_p9)
}
  0x33   :  { %54 = dma.hbm_to_vmem [thread:$0]  %s1569_s4, 3072, %s49_s29, [#allocation6], %s1321_s11, %s1321_s11, %s1322_s12  }
  0x34   :  { %1314 = dma.done.wait [#allocation3], 512  }
  0x35   :  { %1315 = vsyncadd [#allocation3], 4294966784 }
  0x36   :  { %1316 = dma.done.wait [#allocation6], 4608  }
  0x37   :  { %1317 = vsyncadd [#allocation6], 4294962688  ;;  %v69_v0 = vlaneseq  ;;  %v1186_v2 = vld [vmem:[#allocation5 + $0x20] sm:$0xff]   ;;  %v1187_v3 = vld [vmem:[#allocation5 + $0x28] sm:$0xff]   ;;  %vm240_vm0 = vcmask 523264   ;;  %vm138_vm1 = vcmask 1040384  }
  0x38   :  { %1110 = vmatprep.subr.bf16.mxu0 %v1186_v2  ;;  %v1188_v6 = vld [vmem:[#allocation5 + $0x30] sm:$0xff]   ;;  %v130_v7 = vld [vmem:[#allocation2] sm:$0xff]  ;;  %v131_v8 = vld [vmem:[#allocation2 + $0x8] sm:$0xff]  ;;  %vm151_vm2 = vcmask 1046528   ;;  %s1327_s4 = smov 16   ;;  %s1328_s12 = smov 32  }
  0x39   :  { %v1417_v1 = vshrl.u32 %v69_v0, 7  ;;  %1111 = vmatpush3.bf16.msra.mxu0 %v1186_v2  ;;  %v139_v9 = vrot.slane %v130_v7, 7  ;;  %v214_v11 = vpack.c.bf16 %v131_v8, %v130_v7  ;;  %v1422_v12 = vld [vmem:[#allocation2 + $0x10] sm:$0xff]  ;;  %v140_v15 = vrot.slane %v131_v8, 7  ;;  %v1189_v19 = vld [vmem:[#allocation5 + $0x38] sm:$0xff]   ;;  %v1190_v27 = vld [vmem:[#allocation5] sm:$0xff]  }
  0x3a   :  { %1112 = vmatprep.subr.bf16.mxu0 %v1187_v3  ;;  %v153_v16 = vrot.slane %v131_v8, 1  ;;  %v142_v17 = vrot.slane %v1422_v12, 7  ;;  %v155_v18 = vrot.slane %v1422_v12, 1  ;;  %v133_v23 = vld [vmem:[#allocation2 + $0x18] sm:$0xff]  ;;  %v152_v30 = vrot.slane %v130_v7, 1  ;;  %v1191_v33 = vld [vmem:[#allocation5 + $0x8] sm:$0xff]  }
  0x3b   :  { %v72_v4 = vadd.s32 16, %v1417_v1  ;;  %v71_v5 = vadd.s32 8, %v1417_v1  ;;  %v78_v10 = vand.u32 15, %v1417_v1  ;;  %1118 = vmatprep.mubr.msk.bf16.mxu0 %vm240_vm0, %v214_v11  ;;  %v150_v20 = vsel %vm138_vm1, 0.0, %v139_v9  ;;  %v1192_v37 = vld [vmem:[#allocation5 + $0x10] sm:$0xff]   ;;  %v1193_v38 = vld [vmem:[#allocation5 + $0x18] sm:$0xff]  }
  0x3c   :  { %v143_v24 = vsel %vm138_vm1, %v140_v15, %v142_v17  ;;  %v156_v26 = vsel %vm151_vm2, %v153_v16, %v155_v18  ;;  %v141_v28 = vsel %vm138_vm1, %v139_v9, %v140_v15  ;;  %v144_v31 = vrot.slane %v133_v23, 7  ;;  %v1194_v39 = vld [vmem:[#allocation5 + $0x40] sm:$0xff]   ;;  %v1195_v44 = vld [vmem:[#allocation5 + $0x48] sm:$0xff]   ;;  %v1196_v47 = vld [vmem:[#allocation5 + $0x50] sm:$0xff]  }
  0x3d   :  { %v92_v13 = vand.u32 15, %v72_v4  ;;  %v85_v14 = vand.u32 15, %v71_v5  ;;  %1113 = vmatpush3.bf16.msra.mxu0 %v1187_v3  ;;  %vm1428_vm3 = vcmp.ne.s32.totalorder %v78_v10, 0  ;;  %v215_v32 = vpack.c.bf16 %v133_v23, %v1422_v12  ;;  %v1197_v49 = vld [vmem:[#allocation5 + $0x58] sm:$0xff]  }
  0x3e   :  { %1114 = vmatprep.subr.bf16.mxu0 %v1188_v6  ;;  %v172_v29 = vsel %vm1428_vm3, %v150_v20, 0.0  ;;  %v145_v40 = vsel %vm138_vm1, %v142_v17, %v144_v31  ;;  %v154_v41 = vsel %vm151_vm2, %v152_v30, %v153_v16  ;;  %v73_v45 = vadd.s32 24, %v1417_v1  ;;  %v1200_v30 = vld [vmem:[#allocation7 + $0x48] sm:$0xff]   ;;  %v1221_v22 = vld [vmem:[#allocation7 + $0xb8] sm:$0xff]  }
  0x3f   :  { %vm1432_vm4 = vcmp.ne.s32.totalorder %v92_v13, 0  ;;  %vm1437_vm5 = vcmp.ne.s32.totalorder %v85_v14, 15  ;;  %v212_v36 = vpack.c.bf16 %v141_v28, %v172_v29  ;;  %v157_v46 = vrot.slane %v133_v23, 1  ;;  %v1198_v28 = vld [vmem:[#allocation7 + $0x40] sm:$0xff]   ;;  %v1201_v31 = vld [vmem:[#allocation7 + $0x8] sm:$0xff]  }
  0x40   :  { %v174_v34 = vsel %vm1432_vm4, %v143_v24, 0.0  ;;  %v185_v35 = vsel %vm1437_vm5, %v156_v26, 0.0  ;;  %v99_v48 = vand.u32 15, %v73_v45  ;;  %v1199_v29 = vld [vmem:[#allocation7] sm:$0xff]   ;;  %1072 = vmatprep.subr.bf16.mxu1 %v1198_v28  ;;  %vm1330_vm7 = vmmov 1  }
  0x41   :  { %1115 = vmatpush3.bf16.msra.mxu0 %v1188_v6  ;;  %v213_v42 = vpack.c.bf16 %v145_v40, %v174_v34  ;;  %v375_v43 = vpack.c.bf16 %v185_v35, %v154_v41  ;;  %v163_v51 = vsel %vm151_vm2, %v157_v46, 0.0  ;;  %v158_v52 = vsel %vm151_vm2, %v155_v18, %v157_v46  ;;  %1073 = vmatpush3.bf16.msra.mxu1 %v1199_v29  ;;  %v1204_v34 = vld [vmem:[#allocation7 + $0x58] sm:$0xff]   ;;  %v1210_v40 = vld [vmem:[#allocation7 + $0x70] sm:$0xff]   ;;  %vm1042_vm8 = vmpackc.low %vm1330_vm7, %vm1428_vm3 }
  0x42   :  { %1116 = vmatprep.subr.bf16.mxu0 %v1189_v19  ;;  %vm1457_vm6 = vcmp.ne.s32.totalorder %v99_v48, 15  ;;  %1074 = vmatprep.subr.bf16.mxu1 %v1200_v30  ;;  %v1205_v35 = vld [vmem:[#allocation7 + $0x18] sm:$0xff]   ;;  %v1211_v41 = vld [vmem:[#allocation7 + $0x30] sm:$0xff]   ;;  %vm1045_vm9 = vmpackc.low %vm1330_vm7, %vm1432_vm4 }
  0x43   :  { %v187_v53 = vsel %vm1457_vm6, %v163_v51, 0.0  ;;  %vm1048_vm10 = vmpackc.low %vm1437_vm5, %vm1330_vm7 }
  0x44   :  { %v376_v54 = vpack.c.bf16 %v187_v53, %v158_v52  ;;  %v1329_v53 = vmov 1966171168   ;;  %vm1051_vm11 = vmpackc.low %vm1457_vm6, %vm1330_vm7 }
  0x45   :  { %1117 = vmatpush3.bf16.msra.mxu0 %v1189_v19  ;;  %1075 = vmatpush3.bf16.msra.mxu1 %v1201_v31 }
  0x46   :  { %1122 = vmatprep.subr.bf16.mxu0 %v1190_v27 }
  0x48   :  { %1119 = vmatmul.mubr.msk.bf16.vlgmr.msra.gmra.mrb[0].mxu0 %vm240_vm0, %v215_v32  ;;  %v1202_v32 = vld [vmem:[#allocation7 + $0x50] sm:$0xff]  }
  0x49   :  { %1123 = vmatpush3.bf16.msra.mxu0 %v1190_v27  ;;  %1130 = vmatprep.mubr.msk.bf16.mxu0 %vm240_vm0, %v212_v36  ;;  %v1206_v36 = vld [vmem:[#allocation7 + $0x60] sm:$0xff]  }
  0x4a   :  { %1124 = vmatprep.subr.bf16.mxu0 %v1191_v33  ;;  %1076 = vmatprep.subr.bf16.mxu1 %v1202_v32 }
  0x4d   :  { %1125 = vmatpush3.bf16.msra.mxu0 %v1191_v33  ;;  %v1203_v33 = vld [vmem:[#allocation7 + $0x10] sm:$0xff]  }
  0x4e   :  { %1126 = vmatprep.subr.bf16.mxu0 %v1192_v37  ;;  %1077 = vmatpush3.bf16.msra.mxu1 %v1203_v33 }
  0x4f   :  { %1078 = vmatprep.subr.bf16.mxu1 %v1204_v34 }
  0x51   :  { %1127 = vmatpush3.bf16.msra.mxu0 %v1192_v37  ;;  %v1207_v37 = vld [vmem:[#allocation7 + $0x20] sm:$0xff]  }
  0x52   :  { %1128 = vmatprep.subr.bf16.mxu0 %v1193_v38  ;;  %1079 = vmatpush3.bf16.msra.mxu1 %v1205_v35 }
  0x53   :  { %1080 = vmatprep.subr.bf16.mxu1 %v1206_v36 }
  0x55   :  { %1129 = vmatpush3.bf16.msra.mxu0 %v1193_v38  ;;  %v1208_v38 = vld [vmem:[#allocation7 + $0x68] sm:$0xff]  }
  0x56   :  { %1134 = vmatprep.subr.bf16.mxu0 %v1194_v39  ;;  %1081 = vmatpush3.bf16.msra.mxu1 %v1207_v37 }
  0x57   :  { %1082 = vmatprep.subr.bf16.mxu1 %v1208_v38  ;;  %v1215_v38 = vld [vmem:[#allocation7 + $0x88] sm:$0xff]  }
  0x58   :  { %1131 = vmatmul.mubr.msk.bf16.vlgmr.msra.gmra.mrb[0].mxu0 %vm240_vm0, %v213_v42  ;;  %v1212_v42 = vld [vmem:[#allocation7 + $0x78] sm:$0xff]  }
  0x59   :  { %1135 = vmatpush3.bf16.msra.mxu0 %v1194_v39  ;;  %1142 = vmatprep.mubr.msk.bf16.mxu0 %vm240_vm0, %v375_v43  ;;  %v1209_v39 = vld [vmem:[#allocation7 + $0x28] sm:$0xff]   ;;  %v1213_v43 = vld [vmem:[#allocation7 + $0x38] sm:$0xff]  }
  0x5a   :  { %1136 = vmatprep.subr.bf16.mxu0 %v1195_v44  ;;  %1083 = vmatpush3.bf16.msra.mxu1 %v1209_v39 }
  0x5b   :  { %1084 = vmatprep.subr.bf16.mxu1 %v1210_v40 }
  0x5d   :  { %1137 = vmatpush3.bf16.msra.mxu0 %v1195_v44  ;;  %v1491_v44 = vld [vmem:[#allocation7 + $0x80] sm:$0xff]  }
  0x5e   :  { %1138 = vmatprep.subr.bf16.mxu0 %v1196_v47  ;;  %1085 = vmatpush3.bf16.msra.mxu1 %v1211_v41 }
  0x5f   :  { %1086 = vmatprep.subr.bf16.mxu1 %v1212_v42 }
  0x61   :  { %1139 = vmatpush3.bf16.msra.mxu0 %v1196_v47 }
  0x62   :  { %1140 = vmatprep.subr.bf16.mxu0 %v1197_v49  ;;  %1087 = vmatpush3.bf16.msra.mxu1 %v1213_v43 }
  0x63   :  { %1146 = vmatprep.subr.bf16.mxu1 %v1491_v44 }
  0x65   :  { %1141 = vmatpush3.bf16.msra.mxu0 %v1197_v49 }
  0x68   :  { %1143 = vmatmul.mubr.msk.bf16.vlgmr.msra.gmra.mrb[0].mxu0 %vm240_vm0, %v376_v54  ;;  %v507_v54 = vunpack.c.l.s4 %v1329_v53 }
 0x13b   :  { %v1466_v55 = vpop.f32.mrb[0].mxu0 }
 0x13c   :  { %v1468_v56 = vpop.f32.mrb[1].mxu0  ;;  %v473_v62 = vmul.f32 %v1466_v55, %v1466_v55 }
 0x13d   :  { %v1470_v57 = vpop.f32.mrb[2].mxu0  ;;  %v471_v59 = vmul.f32 %v1468_v56, %v1468_v56 }
 0x13e   :  { %v1472_v58 = vpop.f32.mrb[3].mxu0  ;;  %v474_v2 = vmul.f32 %v1470_v57, %v1470_v57 }
 0x13f   :  { %v462_v60 = vadd.f32 %v1472_v58, %v1468_v56  ;;  %v472_v61 = vmul.f32 %v1472_v58, %v1472_v58 }
 0x141   :  { %v463_v63 = vadd.f32 %v1466_v55, %v462_v60  ;;  %v475_v0 = vadd.f32 %v472_v61, %v471_v59  ;;  %v508_v59 = vunpack.c.0.s8 %v507_v54 }
 0x143   :  { %v464_v3 = vadd.f32 %v1470_v57, %v463_v63  ;;  %v476_v4 = vadd.f32 %v475_v0, %v473_v62  ;;  %v1495_v60 = vsub.s32 %v508_v59, %v1417_v1  ;;  %v460_v0 = vld [vmem:[%s1567_s2] sm:$0x1] }
 0x145   :  { %v465_v5 = vrot.slane %v464_v3, 4  ;;  %v477_v6 = vadd.f32 %v476_v4, %v474_v2  ;;  %v1502_v2 = vsub.s32 0, %v1417_v1 }
 0x147   :  { %v466_v7 = vadd.f32 %v465_v5, %v464_v3  ;;  %v478_v8 = vrot.slane %v477_v6, 4  ;;  %v461_v5 = vld [vmem:[%s1568_s3] sm:$0x1] }
 0x149   :  { %v467_v9 = vrot.slane %v466_v7, 2  ;;  %v479_v10 = vadd.f32 %v478_v8, %v477_v6 }
 0x14b   :  { %v468_v11 = vadd.f32 %v467_v9, %v466_v7  ;;  %v480_v12 = vrot.slane %v479_v10, 2 }
 0x14d   :  { %v469_v13 = vrot.slane %v468_v11, 1  ;;  %v481_v14 = vadd.f32 %v480_v12, %v479_v10 }
 0x14f   :  { %v482_v15 = vrot.slane %v481_v14, 1  ;;  %v470_v16 = vadd.f32 %v469_v13, %v468_v11 }
 0x151   :  { %v483_v17 = vadd.f32 %v482_v15, %v481_v14 }
 0x153   :  { %v484_v18 = vsel %vm138_vm1, %v470_v16, %v483_v17 }
 0x154   :  { %485 = vrot.lane.b32.xlu0 %v484_v18, %s1325_s25 }
 0x1c6   :  { %v486_v19 = vpop.permute.xlu0 %485 }
 0x1c7   :  { %v487_v20 = vadd.f32 %v486_v19, %v484_v18 }
 0x1c9   :  { %488 = vrot.lane.b32.xlu0 %v487_v20, %s1327_s4 }
 0x23b   :  { %v489_v23 = vpop.permute.xlu0 %488 }
 0x23c   :  { %v490_v24 = vadd.f32 %v489_v23, %v487_v20 }
 0x23e   :  { %491 = vrot.lane.b32.xlu1 %v490_v24, %s1328_s12 }
 0x2b0   :  { %v492_v26 = vpop.permute.xlu1 %491 }
 0x2b1   :  { %v493_v27 = vadd.f32 %v492_v26, %v490_v24 }
 0x2b3   :  { %494 = vrot.lane.b32.xlu1 %v493_v27, %s1321_s11 }
 0x325   :  { %v495_v45 = vpop.permute.xlu1 %494 }
 0x326   :  { %v496_v46 = vadd.f32 %v495_v45, %v493_v27 }
 0x328   :  { %v497_v47 = vmul.f32 0.001953125, %v496_v46 }
 0x32a   :  { %v498_v48 = vmul.f32 %v497_v47, %v497_v47 }
 0x32c   :  { %v500_v49 = vrot.slane %v498_v48, 7  ;;  %v1217_v48 = vld [vmem:[#allocation7 + $0x98] sm:$0xff]  }
 0x32e   :  { %v502_v51 = vsub.f32 %v497_v47, %v500_v49  ;;  %v1219_v49 = vld [vmem:[#allocation7 + $0xa8] sm:$0xff]  }
 0x330   :  { %v503_v52 = vadd.f32 1e-05, %v502_v51  ;;  %v1220_v51 = vld [vmem:[#allocation7 + $0xb0] sm:$0xff]  }
 0x332   :  { %1222 = vrsqrt.f32 %v503_v52 }
 0x33c   :  { %v1223_v61 = vpop.eup %1222 }
 0x33d   :  { %v512_v62 = vrot.slane %v1223_v61, %v1495_v60 }
 0x33f   :  { %v513_v63 = vcombine.high %v512_v62, %v512_v62 }
 0x341   :  { %v520_v3 = vrot.slane %v513_v63, %v1495_v60 }
 0x343   :  { %v522_v4 = vmul.f32 %v520_v3, %v460_v0 }
 0x345   :  { %v523_v6 = vmul.f32 %v522_v4, %v497_v47  ;;  %v529_v7 = vrot.slane %v522_v4, %v1502_v2  ;;  %v1216_v47 = vld [vmem:[#allocation7 + $0x90] sm:$0xff]  }
 0x347   :  { %v524_v8 = vsub.f32 %v461_v5, %v523_v6  ;;  %v531_v9 = vmul.f32 %v529_v7, %v1468_v56  ;;  %v532_v11 = vmul.f32 %v529_v7, %v1472_v58  ;;  %v533_v1 = vmul.f32 %v1466_v55, %v529_v7 }
 0x348   :  { %v534_v12 = vmul.f32 %v1470_v57, %v529_v7 }
 0x349   :  { %v539_v10 = vrot.slane %v524_v8, %v1502_v2 }
 0x34b   :  { %v541_v13 = vadd.f32 %v539_v10, %v531_v9  ;;  %v542_v14 = vadd.f32 %v539_v10, %v532_v11  ;;  %v543_v15 = vadd.f32 %v539_v10, %v533_v1  ;;  %v544_v16 = vadd.f32 %v539_v10, %v534_v12 }
 0x34d   :  { %v545_v17 = vmul.f32 0.2, %v541_v13  ;;  %v546_v18 = vmul.f32 0.2, %v542_v14  ;;  %v547_v19 = vmul.f32 0.2, %v543_v15 }
 0x34e   :  { %v548_v20 = vmul.f32 0.2, %v544_v16 }
 0x34f   :  { %v549_v23 = vmax.f32 %v541_v13, %v545_v17  ;;  %v550_v24 = vmax.f32 %v542_v14, %v546_v18  ;;  %v551_v26 = vmax.f32 %v543_v15, %v547_v19 }
 0x350   :  { %v552_v56 = vmax.f32 %v544_v16, %v548_v20 }
 0x351   :  { %v557_v27 = vrot.slane %v549_v23, 7  ;;  %v558_v28 = vrot.slane %v550_v24, 7  ;;  %v569_v29 = vrot.slane %v549_v23, 1  ;;  %v570_v58 = vrot.slane %v550_v24, 1 }
 0x352   :  { %v591_v30 = vpack.c.bf16 %v550_v24, %v549_v23  ;;  %v574_v55 = vrot.slane %v552_v56, 1  ;;  %v592_v31 = vpack.c.bf16 %v552_v56, %v551_v26  ;;  %v560_v57 = vrot.slane %v551_v26, 7 }
 0x353   :  { %v559_v32 = vsel %vm138_vm1, %v557_v27, %v558_v28  ;;  %v568_v33 = vsel %vm138_vm1, 0.0, %v557_v27  ;;  %v562_v34 = vrot.slane %v552_v56, 7  ;;  %v571_v35 = vsel %vm151_vm2, %v569_v29, %v570_v58 }
 0x354   :  { %819 = vmatprep.mubr.bf16.mxu1 %v591_v30  ;;  %v1043_v36 = vpack.c.bf16 %v559_v32, %v568_v33  ;;  %v580_v37 = vsel %vm151_vm2, %v574_v55, 0.0  ;;  %v561_v39 = vsel %vm138_vm1, %v558_v28, %v560_v57  ;;  %v572_v40 = vrot.slane %v551_v26, 1 }
 0x355   :  { %v563_v41 = vsel %vm138_vm1, %v560_v57, %v562_v34 }
 0x356   :  { %1044 = vmatmul.mubr.msk.bf16.vlgmr.msra.gmra.mrb[0].mxu1 %vm1042_vm8, %v1043_v36  ;;  %v1046_v42 = vpack.c.bf16 %v563_v41, %v561_v39  ;;  %v573_v43 = vsel %vm151_vm2, %v570_v58, %v572_v40  ;;  %v575_v21 = vsel %vm151_vm2, %v572_v40, %v574_v55 }
 0x357   :  { %1147 = vmatpush3.bf16.msra.mxu1 %v1491_v44  ;;  %827 = vmatprep.mubr.bf16.mxu1 %v592_v31  ;;  %v1049_v45 = vpack.c.bf16 %v573_v43, %v571_v35  ;;  %v1052_v46 = vpack.c.bf16 %v580_v37, %v575_v21  ;;  %v1218_v44 = vld [vmem:[#allocation7 + $0xa0] sm:$0xff]  }
 0x358   :  { %1148 = vmatprep.subr.bf16.mxu1 %v1215_v38 }
 0x35b   :  { %1149 = vmatpush3.bf16.msra.mxu1 %v1215_v38 }
 0x35c   :  { %1150 = vmatprep.subr.bf16.mxu1 %v1216_v47 }
 0x35e   :  { %1047 = vmatmul.mubr.msk.bf16.gmra.mrb[4].mxu1 %vm1045_vm9, %v1046_v42 }
 0x35f   :  { %1151 = vmatpush3.bf16.msra.mxu1 %v1216_v47  ;;  %1162 = vmatprep.mubr.msk.bf16.mxu1 %vm1048_vm10, %v1049_v45 }
 0x360   :  { %1152 = vmatprep.subr.bf16.mxu1 %v1217_v48 }
 0x363   :  { %1153 = vmatpush3.bf16.msra.mxu1 %v1217_v48 }
 0x364   :  { %1154 = vmatprep.subr.bf16.mxu1 %v1218_v44 }
 0x367   :  { %1155 = vmatpush3.bf16.msra.mxu1 %v1218_v44 }
 0x368   :  { %1156 = vmatprep.subr.bf16.mxu1 %v1219_v49 }
 0x36b   :  { %1157 = vmatpush3.bf16.msra.mxu1 %v1219_v49  ;;  %v885_v49 = vld [vmem:[%s1570_s5] sm:$0x1]  ;;  %s1331_s5 = smov [#allocation8]  }
 0x36c   :  { %1158 = vmatprep.subr.bf16.mxu1 %v1220_v51  ;;  %s987_s23 = sshll.u32 %s1331_s5, 4  ;;  %s988_s23 = int_to_ptr.vmem [resolvable:$true] %s987_s23 }
 0x36d   :  { %p1297_p11 = scmp.lt.s32.totalorder %s988_s23, %s988_s23 }
 0x36f   :  { %1159 = vmatpush3.bf16.msra.mxu1 %v1220_v51 }
 0x370   :  { %1160 = vmatprep.subr.bf16.mxu1 %v1221_v22 }
 0x373   :  { %1161 = vmatpush3.bf16.msra.mxu1 %v1221_v22 }
 0x376   :  { %1163 = vmatmul.mubr.msk.bf16.vlgmr.msra.gmra.mrb[8].mxu1 %vm1051_vm11, %v1052_v46 }
 0x429   :  { %v1088_v25 = vpop.f32.mrb[0].mxu1 }
 0x42a   :  { %v1089_v52 = vpop.f32.mrb[1].mxu1 }
 0x42b   :  { %v1090_v53 = vadd.f32 %v1089_v52, %v1088_v25  ;;  %v1091_v54 = vpop.f32.mrb[2].mxu1  ;;  %v886_v25 = vld [vmem:[%s1571_s6] sm:$0x1]  ;;  %s1292_s6 = scalar_lea.vmem %s988_s23, 512 }
 0x42c   :  { %v1092_v59 = vpop.f32.mrb[3].mxu1  ;;  %p1293_p10 = scmp.ne.s32.totalorder %s988_s23, %s1292_s6  ;;  %p1298_p12 = scmp.lt.s32.totalorder %s1292_s6, %s1292_s6 }
 0x42d   :  { %v1093_v61 = vadd.f32 %v1092_v59, %v1091_v54 }
 0x42e   :  { %p1299_p13 = por %p1298_p12, %p1297_p11 }
 0x430   :  { %p1300_p0 = pnand %p1299_p13, %p1293_p10 }
 0x431   :  { %v1094_v62 = vpop.f32.mrb[4].mxu1 }
 0x432   :  { %v1095_v63 = vpop.f32.mrb[5].mxu1 }
 0x433   :  { %v1096_v0 = vadd.f32 %v1095_v63, %v1094_v62  ;;  %v1097_v3 = vpop.f32.mrb[6].mxu1 }
 0x434   :  { %v1098_v4 = vpop.f32.mrb[7].mxu1 }
 0x435   :  { %v1099_v5 = vadd.f32 %v1098_v4, %v1097_v3 }
 0x449   :  { %v1164_v6 = vpop.f32.mrb[8].mxu1 }
 0x44a   :  { %v879_v7 = vadd.f32 %v1164_v6, %v1096_v0  ;;  %v870_v8 = vpop.f32.mrb[9].mxu1 }
 0x44b   :  { %v871_v9 = vadd.f32 %v1090_v53, %v870_v8  ;;  %v1165_v10 = vpop.f32.mrb[10].mxu1 }
 0x44c   :  { %v882_v50 = vadd.f32 %v1165_v10, %v1099_v5  ;;  %v873_v11 = vpop.f32.mrb[11].mxu1  ;;  %v898_v15 = vmul.f32 %v879_v7, %v879_v7 }
 0x44d   :  { %v874_v1 = vadd.f32 %v1093_v61, %v873_v11  ;;  %v896_v12 = vmul.f32 %v871_v9, %v871_v9 }
 0x44e   :  { %v899_v18 = vmul.f32 %v882_v50, %v882_v50 }
 0x44f   :  { %v887_v13 = vadd.f32 %v874_v1, %v871_v9  ;;  %v897_v14 = vmul.f32 %v874_v1, %v874_v1 }
 0x451   :  { %v888_v16 = vadd.f32 %v887_v13, %v879_v7  ;;  %v900_v17 = vadd.f32 %v897_v14, %v896_v12 }
 0x453   :  { %v889_v19 = vadd.f32 %v888_v16, %v882_v50  ;;  %v901_v20 = vadd.f32 %v900_v17, %v898_v15 }
 0x455   :  { %v890_v23 = vrot.slane %v889_v19, 4  ;;  %v902_v24 = vadd.f32 %v901_v20, %v899_v18 }
 0x457   :  { %v891_v26 = vadd.f32 %v890_v23, %v889_v19  ;;  %v903_v56 = vrot.slane %v902_v24, 4 }
 0x459   :  { %v892_v27 = vrot.slane %v891_v26, 2  ;;  %v904_v28 = vadd.f32 %v903_v56, %v902_v24 }
 0x45b   :  { %v893_v29 = vadd.f32 %v892_v27, %v891_v26  ;;  %v905_v58 = vrot.slane %v904_v28, 2 }
 0x45d   :  { %v894_v30 = vrot.slane %v893_v29, 1  ;;  %v906_v55 = vadd.f32 %v905_v58, %v904_v28 }
 0x45f   :  { %v907_v31 = vrot.slane %v906_v55, 1  ;;  %v895_v57 = vadd.f32 %v894_v30, %v893_v29 }
 0x461   :  { %v908_v32 = vadd.f32 %v907_v31, %v906_v55 }
 0x463   :  { %v909_v33 = vsel %vm138_vm1, %v895_v57, %v908_v32 }
 0x464   :  { %910 = vrot.lane.b32.xlu0 %v909_v33, %s1325_s25 }
 0x4d6   :  { %v911_v34 = vpop.permute.xlu0 %910 }
 0x4d7   :  { %v912_v35 = vadd.f32 %v911_v34, %v909_v33 }
 0x4d9   :  { %913 = vrot.lane.b32.xlu1 %v912_v35, %s1327_s4 }
 0x54b   :  { %v914_v36 = vpop.permute.xlu1 %913 }
 0x54c   :  { %v915_v37 = vadd.f32 %v914_v36, %v912_v35 }
 0x54e   :  { %916 = vrot.lane.b32.xlu0 %v915_v37, %s1328_s12 }
 0x5c0   :  { %v917_v38 = vpop.permute.xlu0 %916 }
 0x5c1   :  { %v918_v39 = vadd.f32 %v917_v38, %v915_v37 }
 0x5c3   :  { %919 = vrot.lane.b32.xlu1 %v918_v39, %s1321_s11 }
 0x635   :  { %v920_v40 = vpop.permute.xlu1 %919 }
 0x636   :  { %v921_v41 = vadd.f32 %v920_v40, %v918_v39 }
 0x638   :  { %v922_v42 = vmul.f32 0.001953125, %v921_v41 }
 0x63a   :  { %v923_v43 = vmul.f32 %v922_v42, %v922_v42 }
 0x63c   :  { %v925_v21 = vrot.slane %v923_v43, 7 }
 0x63e   :  { %v927_v45 = vsub.f32 %v922_v42, %v925_v21 }
 0x640   :  { %v928_v46 = vadd.f32 1e-05, %v927_v45 }
 0x642   :  { %1224 = vrsqrt.f32 %v928_v46 }
 0x64c   :  { %v1225_v47 = vpop.eup %1224 }
 0x64d   :  { %v937_v48 = vrot.slane %v1225_v47, %v1495_v60 }
 0x64f   :  { %v938_v44 = vcombine.high %v937_v48, %v937_v48 }
 0x651   :  { %v945_v51 = vrot.slane %v938_v44, %v1495_v60 }
 0x653   :  { %v947_v22 = vmul.f32 %v945_v51, %v885_v49 }
 0x655   :  { %v948_v52 = vmul.f32 %v947_v22, %v922_v42  ;;  %v954_v53 = vrot.slane %v947_v22, %v1502_v2 }
 0x657   :  { %v949_v54 = vsub.f32 %v886_v25, %v948_v52  ;;  %v956_v59 = vmul.f32 %v954_v53, %v871_v9  ;;  %v957_v62 = vmul.f32 %v954_v53, %v874_v1  ;;  %v958_v63 = vmul.f32 %v954_v53, %v879_v7 }
 0x658   :  { %v959_v0 = vmul.f32 %v954_v53, %v882_v50 }
 0x659   :  { %v964_v61 = vrot.slane %v949_v54, %v1502_v2 }
 0x65b   :  { %v966_v3 = vadd.f32 %v964_v61, %v956_v59  ;;  %v967_v4 = vadd.f32 %v964_v61, %v957_v62  ;;  %v968_v5 = vadd.f32 %v964_v61, %v958_v63  ;;  %v969_v6 = vadd.f32 %v964_v61, %v959_v0 }
 0x65d   :  { %v970_v60 = vmul.f32 0.2, %v966_v3  ;;  %v971_v8 = vmul.f32 0.2, %v967_v4  ;;  %v972_v10 = vmul.f32 0.2, %v968_v5 }
 0x65e   :  { %v973_v11 = vmul.f32 0.2, %v969_v6 }
 0x65f   :  { %v974_v12 = vmax.f32 %v966_v3, %v970_v60  ;;  %v975_v13 = vmax.f32 %v967_v4, %v971_v8  ;;  %v976_v14 = vmax.f32 %v968_v5, %v972_v10 }
 0x660   :  { %v977_v15 = vmax.f32 %v969_v6, %v973_v11 }
 0x661   :  { %978 = vst [vmem:[#allocation8] sm:$0xff] %v974_v12  ;;  %979 = vst [vmem:[#allocation8 + $0x8] sm:$0xff] %v975_v13 }
 0x662   :  { %980 = vst [vmem:[#allocation8 + $0x10] sm:$0xff] %v976_v14  ;;  %981 = vst [vmem:[#allocation8 + $0x18] sm:$0xff] %v977_v15 }
 0x663   :  { %1303 = shalt.err (!%p1300_p0)
}
 0x664   :  { %s1304_s27 = scalar_lea.hbm %s1572_s7, 512 }
 0x665   :  { %p1305_p1 = scmp.ne.s32.totalorder %s1572_s7, %s1304_s27  ;;  %p1308_p2 = scmp.lt.u32.totalorder %s1304_s27, %s1572_s7 }
 0x667   :  { %p1310_p3 = pnand %p1308_p2, %p1305_p1 }
 0x669   :  { %1313 = shalt.err (!%p1310_p3)
}
 0x66a   :  { %993 = dma.vmem_to_hbm [thread:$0]  %s988_s23, 512, %s1572_s7, [#allocation4], %s1324_s1, %s1324_s1, %s1325_s25  }
 0x66b   :  { %1318 = dma.done.wait [#allocation4], 512  }
 0x66c   :  { %1319 = vsyncadd [#allocation4], 4294966784 }
 0x66d   :  { %997 = vsyncpa [#allocation3], 1 }
 0x66e   :  { %998 = vsyncpa [#allocation6], 1 }
 0x66f   :  { %999 = vsyncpa [#allocation4], 1 }

</bundles_post_ra>
